<compile_context>
chip_gen: v6e
topology: v6e:2x2x1
jax: 0.10.0
libtpu: 0.0.40
codegen_flags: <defaults>
</compile_context>

<pallas_src>
import jax
import jax.numpy as jnp
from jax.experimental import pallas as pl
from jax.experimental.pallas import tpu as pltpu


# ----------------------------------------------------------------------------
# Hot path: IdentityMap.forward(x, *args, **kwargs) -> x
# ----------------------------------------------------------------------------
def identity_map(x: jax.Array, *args, **kwargs) -> jax.Array:
    """IdentityMap forward. Pure pass-through: no kernel, no HBM round trip."""
    return x


def identity_map_config():
    return {"mm_projector_type": "identity"}


# ----------------------------------------------------------------------------
# Materialized-copy variant: direct HBM->HBM DMA (no VMEM staging).
# ----------------------------------------------------------------------------
def _make_dma_copy_kernel(chunk_bounds):
    """Build a kernel copying x -> o via len(chunk_bounds) async HBM->HBM DMAs."""

    def kernel(x_hbm, o_hbm, sem):
        copies = []
        for i, (start, size) in enumerate(chunk_bounds):
            sl = pl.ds(start, size)
            cp = pltpu.make_async_copy(x_hbm.at[sl], o_hbm.at[sl], sem.at[i])
            cp.start()
            copies.append(cp)
        for cp in copies:
            cp.wait()

    return kernel


def identity_map_pallas(x: jax.Array, *, max_chunks: int = 4) -> jax.Array:
    """Identity as an explicit, materialized HBM->HBM DMA copy."""
    if x.size == 0:
        # Nothing to copy; a fresh buffer of the right shape/dtype is a valid
        # materialized copy of an empty tensor.
        return jnp.zeros(x.shape, x.dtype)

    orig_shape = x.shape
    reshaped = False
    if x.ndim == 0:
        # Give the DMA at least one dimension to slice along.
        x = x.reshape(1)
        reshaped = True

    # Chunk the leading dimension (statically, at trace time) so several DMA
    # engines can work concurrently on large tensors. Small tensors (< 1 MiB)
    # use a single whole-tensor DMA — chunking buys nothing there.
    total_bytes = x.size * x.dtype.itemsize
    lead = x.shape[0]
    if total_bytes < (1 << 20):
        n_chunks = 1
    else:
        n_chunks = max(1, min(max_chunks, lead))

    base, rem = divmod(lead, n_chunks)
    chunk_bounds = []
    start = 0
    for i in range(n_chunks):
        size = base + (1 if i < rem else 0)
        if size == 0:
            continue
        chunk_bounds.append((start, size))
        start += size
    n_chunks = len(chunk_bounds)

    out = pl.pallas_call(
        _make_dma_copy_kernel(tuple(chunk_bounds)),
        out_shape=jax.ShapeDtypeStruct(x.shape, x.dtype),
        in_specs=[pl.BlockSpec(memory_space=pl.ANY)],
        out_specs=pl.BlockSpec(memory_space=pl.ANY),
        scratch_shapes=[pltpu.SemaphoreType.DMA((n_chunks,))],
        cost_estimate=pl.CostEstimate(
            flops=0, transcendentals=0, bytes_accessed=2 * total_bytes
        ),
    )(x)

    if reshaped:
        out = out.reshape(orig_shape)
    return out


if __name__ == "__main__":
    key = jax.random.PRNGKey(0)
    k0, k1, k2 = jax.random.split(key, 3)

    # Small shapes consistent with a projector input: [batch, seq, hidden].
    x = jax.random.normal(k0, (2, 8, 32), dtype=jnp.float32)
    x_bf16 = jax.random.normal(k1, (2, 16, 128), dtype=jnp.float32).astype(
        jnp.bfloat16
    )
    # Arbitrary (non-128-multiple) size: the direct-DMA copy handles it.
    x_odd = jax.random.normal(k2, (3, 5, 7), dtype=jnp.float32)

    # Hot path (no-op), matching forward(x, *args, **kwargs).
    y = identity_map(x, "extra_positional_arg", some_kwarg=123)
    jax.block_until_ready(y)
    assert y.shape == x.shape and y.dtype == x.dtype
    assert bool(jnp.all(y == x))

    # Materialized-copy (direct HBM->HBM DMA) variant.
    y_pk = identity_map_pallas(x)
    jax.block_until_ready(y_pk)
    assert y_pk.shape == x.shape and y_pk.dtype == x.dtype
    assert bool(jnp.all(y_pk == x))

    y_pk16 = identity_map_pallas(x_bf16)
    jax.block_until_ready(y_pk16)
    assert y_pk16.shape == x_bf16.shape and y_pk16.dtype == x_bf16.dtype
    assert bool(jnp.all(y_pk16 == x_bf16))

    y_odd = identity_map_pallas(x_odd)
    jax.block_until_ready(y_odd)
    assert y_odd.shape == x_odd.shape and y_odd.dtype == x_odd.dtype
    assert bool(jnp.all(y_odd == x_odd))

    assert identity_map_config() == {"mm_projector_type": "identity"}
    print("KERNEL_OK")
</pallas_src>

<mosaic_0001>
module attributes {stable_mosaic.version = 11 : i64} {
  func.func @kernel(%arg0: memref<2x8x32xf32, #tpu.memory_space<any>>, %arg1: memref<2x8x32xf32, #tpu.memory_space<any>>, %arg2: memref<1x!tpu.dma_semaphore, #tpu.memory_space<semaphore_mem>>) attributes {dimension_semantics = [], scalar_prefetch = 0 : i64, scratch_operands = 1 : i64, tpu.core_type = #tpu.core_type<tc>} {
    %c0_i32 = arith.constant 0 : i32
    %c0_i32_0 = arith.constant 0 : i32
    %c0_i32_1 = arith.constant 0 : i32
    %c0_i32_2 = arith.constant 0 : i32
    %0 = tpu.memref_slice %arg0[%c0_i32_0, %c0_i32_1, %c0_i32_2] : memref<2x8x32xf32, #tpu.memory_space<any>> -> memref<2x8x32xf32, #tpu.memory_space<any>>
    %c0_i32_3 = arith.constant 0 : i32
    %c0_i32_4 = arith.constant 0 : i32
    %c0_i32_5 = arith.constant 0 : i32
    %1 = tpu.memref_slice %arg1[%c0_i32_3, %c0_i32_4, %c0_i32_5] : memref<2x8x32xf32, #tpu.memory_space<any>> -> memref<2x8x32xf32, #tpu.memory_space<any>>
    %2 = tpu.memref_slice %arg2[%c0_i32] : memref<1x!tpu.dma_semaphore, #tpu.memory_space<semaphore_mem>> -> memref<1x!tpu.dma_semaphore, #tpu.memory_space<semaphore_mem>>
    %3 = tpu.memref_squeeze %2 : memref<1x!tpu.dma_semaphore, #tpu.memory_space<semaphore_mem>> -> memref<!tpu.dma_semaphore, #tpu.memory_space<semaphore_mem>>
    tpu.enqueue_dma source(%0 : memref<2x8x32xf32, #tpu.memory_space<any>>) target(%1 : memref<2x8x32xf32, #tpu.memory_space<any>>) target_semaphore(%3 : memref<!tpu.dma_semaphore, #tpu.memory_space<semaphore_mem>>)
    %c0_i32_6 = arith.constant 0 : i32
    %c0_i32_7 = arith.constant 0 : i32
    %c0_i32_8 = arith.constant 0 : i32
    %c0_i32_9 = arith.constant 0 : i32
    %4 = tpu.memref_slice %arg0[%c0_i32_7, %c0_i32_8, %c0_i32_9] : memref<2x8x32xf32, #tpu.memory_space<any>> -> memref<2x8x32xf32, #tpu.memory_space<any>>
    %c0_i32_10 = arith.constant 0 : i32
    %c0_i32_11 = arith.constant 0 : i32
    %c0_i32_12 = arith.constant 0 : i32
    %5 = tpu.memref_slice %arg1[%c0_i32_10, %c0_i32_11, %c0_i32_12] : memref<2x8x32xf32, #tpu.memory_space<any>> -> memref<2x8x32xf32, #tpu.memory_space<any>>
    %6 = tpu.memref_slice %arg2[%c0_i32_6] : memref<1x!tpu.dma_semaphore, #tpu.memory_space<semaphore_mem>> -> memref<1x!tpu.dma_semaphore, #tpu.memory_space<semaphore_mem>>
    %7 = tpu.memref_squeeze %6 : memref<1x!tpu.dma_semaphore, #tpu.memory_space<semaphore_mem>> -> memref<!tpu.dma_semaphore, #tpu.memory_space<semaphore_mem>>
    tpu.wait_dma2 semaphore(%7 : memref<!tpu.dma_semaphore, #tpu.memory_space<semaphore_mem>>) src(%4 : memref<2x8x32xf32, #tpu.memory_space<any>>) dst(%5 : memref<2x8x32xf32, #tpu.memory_space<any>>)
    return
  }
}

</mosaic_0001>

<bundles_post_ra>
// kernel: tpu_custom_call.1
= control target key start
LH: loop header
LB: loop body
LE: loop exit
PB: predicated region body
PF: predicated region fallthrough
CT: control target
= control target key end

     0   :  { %s29_s6 = smov [#allocation2]   ;;  %s30_s7 = smov 131072   ;;  %s48_s0 = inlined_call_operand.hbm [shape: f32[2,8,32], index: 0, kind: input, shape index: {}]   ;;  %s49_s1 = inlined_call_operand.hbm [shape: f32[2,8,32], index: 1, kind: output, shape index: {}]  }
   0x1   :  { %s31_s8 = smov 0  }
   0x2   :  { %12 = dma.general %s48_s0, 256, %s49_s1, %s29_s6, %s30_s7, [#allocation4], %s31_s8, 0  }
   0x3   :  { %27 = dma.done.wait [#allocation2], 256 }
   0x4   :  { %28 = vsyncadd [#allocation2], 4294967040 }
   0x5   :  { %17 = vsyncmov [#allocation2] }
   0x8   :  { %s18_s13 = vpop.sfrf %17 }
   0x9   :  { %p23_p0 = scmp.ne.s32.totalorder %s18_s13, 0 }
   0xb   :  { %22 = shalt.err (%p23_p0)  }

</bundles_post_ra>
